<compile_context>
chip_gen: v7x
topology: tpu7x:2x2x1
jax: 0.10.0
libtpu: 0.0.40
codegen_flags: <defaults>
</compile_context>

<pallas_src>
import functools

import numpy as np
import jax
import jax.numpy as jnp
from jax.experimental import pallas as pl
from jax.experimental.pallas import tpu as pltpu


# ----------------------------------------------------------------------------
# Fused kernel (one grid step == one batch element; everything stays in VMEM)
# ----------------------------------------------------------------------------
def _interaction_kernel(low_ref, high_ref, masks_ref, w1_ref, b1_ref,
                        smean_ref, w3_ref, b3_ref, o_ref, *, H, W):
    """
    low_ref:   (1, in_dim, H*W)  flattened-spatial low features
    high_ref:  (1, dim,    H*W)  flattened-spatial high features
    masks_ref: (9, H*W)          border validity mask per 3x3 tap
    w1_ref:    (dim, 9*in_dim)   conv1 weight in im2col layout (tap-major)
    b1_ref:    (dim, 1)          conv1 bias
    smean_ref: (dim, 1)          mean seed vector
    w3_ref:    (dim, 9*dim)      depth-folded Conv3d weight, im2col layout
    b3_ref:    (dim, 1)          Conv3d bias
    o_ref:     (1, dim, H*W)     output
    """
    f32 = jnp.float32
    HW = H * W

    # Hoist shared constants once per grid step (reused by both convs / maps).
    masks = masks_ref[...].astype(f32)                    # (9, HW)
    mask_rows = [masks[t:t + 1, :] for t in range(9)]     # nine (1, HW) views
    smean = smean_ref[...].astype(f32)                    # (dim, 1)

    def im2col(x):
        """x: (C, HW) -> (9*C, HW) patch matrix for a 3x3 'same' conv.

        Spatial +/-1 shifts are lane rotations (XLU) of the flattened image;
        out-of-image taps are zeroed by the precomputed border masks.
        """
        taps = []
        t = 0
        for ky in range(3):
            for kx in range(3):
                if ky == 1 and kx == 1:
                    tap = x                               # center: no shift/mask
                else:
                    off = (ky - 1) * W + (kx - 1)         # flat-index offset
                    tap = pltpu.roll(x, shift=(-off) % HW, axis=1)
                    tap = tap * mask_rows[t]
                taps.append(tap)
                t += 1
        return jnp.concatenate(taps, axis=0)              # (9*C, HW)

    def cormap_plus_one(x):
        """x: (dim, HW) -> (1, HW); mean seed-correlation of F.normalize(x), +1."""
        sumsq = jnp.sum(x * x, axis=0, keepdims=True)
        # 1 / max(||x||, 1e-12) == rsqrt(max(||x||^2, 1e-24));  rsqrt -> EUP.
        inv = jax.lax.rsqrt(jnp.maximum(sumsq, 1e-24))
        corr = jnp.sum(x * smean, axis=0, keepdims=True)
        return corr * inv + 1.0

    low = low_ref[0].astype(f32)                          # (in_dim, HW)
    high = high_ref[0].astype(f32)                        # (dim,    HW)

    # conv1: single im2col matmul on the MXU.
    low_f = jnp.dot(w1_ref[...].astype(f32), im2col(low),
                    preferred_element_type=f32) + b1_ref[...].astype(f32)

    # Seed-correlation re-weighting:  x * cormap + x == x * (cormap + 1).
    low_w = low_f * cormap_plus_one(low_f)
    high_w = high * cormap_plus_one(high)

    # TODO(synk): ACM(dim) definition not provided -> elementwise-add placeholder;
    # RefUnet(dim, dim//2) not provided -> identity placeholder (f_m == fuse).
    fuse = high_w + low_w

    # Depth-2 Conv3d (k=(2,3,3), pad=(0,1,1)) on [fuse, f_m]; with f_m == fuse it
    # collapses to one 3x3 conv with the depth-summed weight (folded in wrapper).
    com = jnp.dot(w3_ref[...].astype(f32), im2col(fuse),
                  preferred_element_type=f32) + b3_ref[...].astype(f32)
    o_ref[...] = jnp.maximum(com, 0.0)[None].astype(o_ref.dtype)


def _conv3x3_tap_masks(H, W):
    """(9, H*W) f32 mask; masks[ky*3+kx, p]=1 iff tap (ky,kx) reads inside the image."""
    yy, xx = np.mgrid[0:H, 0:W]
    rows = []
    for ky in range(3):
        for kx in range(3):
            valid = ((yy + ky - 1 >= 0) & (yy + ky - 1 <= H - 1) &
                     (xx + kx - 1 >= 0) & (xx + kx - 1 <= W - 1))
            rows.append(valid.reshape(-1))
    return np.stack(rows, axis=0).astype(np.float32)


# ----------------------------------------------------------------------------
# PyTorch-facing wrapper (NCHW in / NCHW out; only reshapes at the boundary)
# ----------------------------------------------------------------------------
def interaction_forward(seed, high, low, params):
    # seed: (Ns, dim, 1, 1)   high: (B, dim, H, W)   low: (B, in_dim, H, W)
    B, in_dim, H, W = low.shape
    dim = high.shape[1]
    HW = H * W

    low3 = low.reshape(B, in_dim, HW)
    high3 = high.reshape(B, dim, HW)
    tap_masks = jnp.asarray(_conv3x3_tap_masks(H, W))            # (9, HW)

    # conv1 weight -> im2col matrix, columns ordered (ky, kx, ci) to match im2col.
    w1_mat = jnp.transpose(params["conv1_w"], (0, 2, 3, 1)).reshape(dim, 9 * in_dim)
    b1 = params["conv1_b"].reshape(dim, 1)

    # mean over the seed bank: mean_s(xn . seed_s) == xn . mean_s(seed_s).
    smean = jnp.mean(seed[:, :, 0, 0], axis=0).reshape(dim, 1)

    # With the RefUnet identity placeholder both depth slices are identical, so
    # Conv3d(k_d=2) == Conv2d with the depth-summed kernel.
    w3 = params["cov3d_w"]                                       # (dim, dim, 2, 3, 3)
    w3_fold = w3[:, :, 0] + w3[:, :, 1]                          # (dim, dim, 3, 3)
    w3_mat = jnp.transpose(w3_fold, (0, 2, 3, 1)).reshape(dim, 9 * dim)
    b3 = params["cov3d_b"].reshape(dim, 1)

    kernel = functools.partial(_interaction_kernel, H=H, W=W)

    # Per-step VMEM footprint ~ (10*dim + 9*in_dim) * H*W * 4 B (a few hundred KiB
    # here).  TODO(synk): for production-sized H*W add a row-tile grid axis with a
    # 1-row halo and size tiles against v7x's 64 MiB VMEM; for large channel counts
    # feed bf16 into the two MXU dots (keep f32 accumulation).
    out = pl.pallas_call(
        kernel,
        out_shape=jax.ShapeDtypeStruct((B, dim, HW), low.dtype),
        grid=(B,),
        in_specs=[
            pl.BlockSpec((1, in_dim, HW), lambda b: (b, 0, 0)),
            pl.BlockSpec((1, dim, HW), lambda b: (b, 0, 0)),
            pl.BlockSpec((9, HW), lambda b: (0, 0)),
            pl.BlockSpec((dim, 9 * in_dim), lambda b: (0, 0)),
            pl.BlockSpec((dim, 1), lambda b: (0, 0)),
            pl.BlockSpec((dim, 1), lambda b: (0, 0)),
            pl.BlockSpec((dim, 9 * dim), lambda b: (0, 0)),
            pl.BlockSpec((dim, 1), lambda b: (0, 0)),
        ],
        out_specs=pl.BlockSpec((1, dim, HW), lambda b: (b, 0, 0)),
        compiler_params=pltpu.CompilerParams(dimension_semantics=("parallel",)),
    )(low3, high3, tap_masks, w1_mat, b1, smean, w3_mat, b3)
    return out.reshape(B, dim, H, W)


# ----------------------------------------------------------------------------
# Pure-JAX/XLA reference (same ACM/RefUnet placeholder semantics) for checking
# ----------------------------------------------------------------------------
def _reference_forward(seed, high, low, params):
    hp = jax.lax.Precision.HIGHEST
    low_f = jax.lax.conv_general_dilated(
        low, params["conv1_w"], (1, 1), ((1, 1), (1, 1)),
        dimension_numbers=("NCHW", "OIHW", "NCHW"), precision=hp)
    low_f = low_f + params["conv1_b"][None, :, None, None]

    seeds2d = seed[:, :, 0, 0]                                   # (Ns, dim)

    def weighting(x):
        n = jnp.sqrt(jnp.sum(x * x, axis=1, keepdims=True))
        xn = x / jnp.maximum(n, 1e-12)                           # F.normalize(dim=1)
        wm = jnp.einsum("bchw,sc->bshw", xn, seeds2d, precision=hp)
        return jnp.mean(wm, axis=1, keepdims=True)               # (B, 1, H, W)

    low_w = low_f * weighting(low_f) + low_f
    high_w = high * weighting(high) + high
    fuse = high_w + low_w
    f_m = fuse                                                   # RefUnet placeholder
    stack = jnp.stack([fuse, f_m], axis=2)                       # (B, C, 2, H, W)
    com = jax.lax.conv_general_dilated(
        stack, params["cov3d_w"], (1, 1, 1), ((0, 0), (1, 1), (1, 1)),
        dimension_numbers=("NCDHW", "OIDHW", "NCDHW"), precision=hp)
    com = com + params["cov3d_b"][None, :, None, None, None]
    return jnp.maximum(com, 0.0)[:, :, 0]


if __name__ == "__main__":
    B, in_dim, dim, H, W, Ns = 2, 4, 8, 16, 16, 4
    key = jax.random.PRNGKey(0)
    ks = jax.random.split(key, 7)

    seed = jax.random.normal(ks[0], (Ns, dim, 1, 1), jnp.float32) * 0.5
    high = jax.random.normal(ks[1], (B, dim, H, W), jnp.float32)
    low = jax.random.normal(ks[2], (B, in_dim, H, W), jnp.float32)

    params = {
        "conv1_w": jax.random.normal(ks[3], (dim, in_dim, 3, 3), jnp.float32) * 0.1,
        "conv1_b": jax.random.normal(ks[4], (dim,), jnp.float32) * 0.1,
        "cov3d_w": jax.random.normal(ks[5], (dim, dim, 2, 3, 3), jnp.float32) * 0.1,
        "cov3d_b": jax.random.normal(ks[6], (dim,), jnp.float32) * 0.1,
    }

    out = jax.jit(interaction_forward)(seed, high, low, params)
    jax.block_until_ready(out)
    assert out.shape == (B, dim, H, W), out.shape
    assert bool(jnp.all(jnp.isfinite(out)))

    # Correctness check against the pure-JAX reference (same placeholders).
    ref = _reference_forward(seed, high, low, params)
    err = float(jnp.max(jnp.abs(out - ref)))
    tol = 1e-2 * max(1.0, float(jnp.max(jnp.abs(ref))))
    assert err <= tol, (err, tol)

    print("KERNEL_OK")
</pallas_src>

<mosaic_0001>
module attributes {stable_mosaic.version = 11 : i64} {
  func.func @_interaction_kernel(%arg0: i32, %arg1: memref<1x4x256xf32, #tpu.memory_space<vmem>>, %arg2: memref<1x8x256xf32, #tpu.memory_space<vmem>>, %arg3: memref<9x256xf32, #tpu.memory_space<vmem>>, %arg4: memref<8x36xf32, #tpu.memory_space<vmem>>, %arg5: memref<8x1xf32, #tpu.memory_space<vmem>>, %arg6: memref<8x1xf32, #tpu.memory_space<vmem>>, %arg7: memref<8x72xf32, #tpu.memory_space<vmem>>, %arg8: memref<8x1xf32, #tpu.memory_space<vmem>>, %arg9: memref<1x8x256xf32, #tpu.memory_space<vmem>>) attributes {dimension_semantics = [#tpu.dimension_semantics<parallel>], iteration_bounds = array<i64: 2>, scalar_prefetch = 0 : i64, scratch_operands = 0 : i64, tpu.core_type = #tpu.core_type<tc>, window_params = [{transform_indices = @transform_0, window_bounds = array<i64: 1, 4, 256>}, {transform_indices = @transform_1, window_bounds = array<i64: 1, 8, 256>}, {pipeline_mode = #tpu.pipeline_mode<synchronous>, transform_indices = @transform_2, window_bounds = array<i64: 9, 256>}, {pipeline_mode = #tpu.pipeline_mode<synchronous>, transform_indices = @transform_3, window_bounds = array<i64: 8, 36>}, {pipeline_mode = #tpu.pipeline_mode<synchronous>, transform_indices = @transform_4, window_bounds = array<i64: 8, 1>}, {pipeline_mode = #tpu.pipeline_mode<synchronous>, transform_indices = @transform_5, window_bounds = array<i64: 8, 1>}, {pipeline_mode = #tpu.pipeline_mode<synchronous>, transform_indices = @transform_6, window_bounds = array<i64: 8, 72>}, {pipeline_mode = #tpu.pipeline_mode<synchronous>, transform_indices = @transform_7, window_bounds = array<i64: 8, 1>}, {transform_indices = @transform_8, window_bounds = array<i64: 1, 8, 256>}]} {
    %c0 = arith.constant 0 : index
    %c0_0 = arith.constant 0 : index
    %0 = vector.load %arg3[%c0, %c0_0] : memref<9x256xf32, #tpu.memory_space<vmem>>, vector<9x256xf32>
    %1 = vector.extract_strided_slice %0 {offsets = [0, 0], sizes = [1, 256], strides = [1, 1]} : vector<9x256xf32> to vector<1x256xf32>
    %2 = vector.extract_strided_slice %0 {offsets = [1, 0], sizes = [1, 256], strides = [1, 1]} : vector<9x256xf32> to vector<1x256xf32>
    %3 = vector.extract_strided_slice %0 {offsets = [2, 0], sizes = [1, 256], strides = [1, 1]} : vector<9x256xf32> to vector<1x256xf32>
    %4 = vector.extract_strided_slice %0 {offsets = [3, 0], sizes = [1, 256], strides = [1, 1]} : vector<9x256xf32> to vector<1x256xf32>
    %5 = vector.extract_strided_slice %0 {offsets = [5, 0], sizes = [1, 256], strides = [1, 1]} : vector<9x256xf32> to vector<1x256xf32>
    %6 = vector.extract_strided_slice %0 {offsets = [6, 0], sizes = [1, 256], strides = [1, 1]} : vector<9x256xf32> to vector<1x256xf32>
    %7 = vector.extract_strided_slice %0 {offsets = [7, 0], sizes = [1, 256], strides = [1, 1]} : vector<9x256xf32> to vector<1x256xf32>
    %8 = vector.extract_strided_slice %0 {offsets = [8, 0], sizes = [1, 256], strides = [1, 1]} : vector<9x256xf32> to vector<1x256xf32>
    %c0_1 = arith.constant 0 : index
    %c0_2 = arith.constant 0 : index
    %9 = vector.load %arg6[%c0_1, %c0_2] : memref<8x1xf32, #tpu.memory_space<vmem>>, vector<8x1xf32>
    %c0_3 = arith.constant 0 : index
    %c0_4 = arith.constant 0 : index
    %c0_5 = arith.constant 0 : index
    %10 = vector.load %arg1[%c0_3, %c0_4, %c0_5] : memref<1x4x256xf32, #tpu.memory_space<vmem>>, vector<1x4x256xf32>
    %11 = vector.shape_cast %10 : vector<1x4x256xf32> to vector<4x256xf32>
    %c0_6 = arith.constant 0 : index
    %c0_7 = arith.constant 0 : index
    %c0_8 = arith.constant 0 : index
    %12 = vector.load %arg2[%c0_6, %c0_7, %c0_8] : memref<1x8x256xf32, #tpu.memory_space<vmem>>, vector<1x8x256xf32>
    %13 = vector.shape_cast %12 : vector<1x8x256xf32> to vector<8x256xf32>
    %c0_9 = arith.constant 0 : index
    %c0_10 = arith.constant 0 : index
    %14 = vector.load %arg4[%c0_9, %c0_10] : memref<8x36xf32, #tpu.memory_space<vmem>>, vector<8x36xf32>
    %c17_i32 = arith.constant 17 : i32
    %15 = tpu.dynamic_rotate %11 by %c17_i32 dim 1 : vector<4x256xf32>, i32 -> vector<4x256xf32>
    %16 = vector.broadcast %1 : vector<1x256xf32> to vector<4x256xf32>
    %17 = arith.mulf %15, %16 : vector<4x256xf32>
    %c16_i32 = arith.constant 16 : i32
    %18 = tpu.dynamic_rotate %11 by %c16_i32 dim 1 : vector<4x256xf32>, i32 -> vector<4x256xf32>
    %19 = vector.broadcast %2 : vector<1x256xf32> to vector<4x256xf32>
    %20 = arith.mulf %18, %19 : vector<4x256xf32>
    %c15_i32 = arith.constant 15 : i32
    %21 = tpu.dynamic_rotate %11 by %c15_i32 dim 1 : vector<4x256xf32>, i32 -> vector<4x256xf32>
    %22 = vector.broadcast %3 : vector<1x256xf32> to vector<4x256xf32>
    %23 = arith.mulf %21, %22 : vector<4x256xf32>
    %c1_i32 = arith.constant 1 : i32
    %24 = tpu.dynamic_rotate %11 by %c1_i32 dim 1 : vector<4x256xf32>, i32 -> vector<4x256xf32>
    %25 = vector.broadcast %4 : vector<1x256xf32> to vector<4x256xf32>
    %26 = arith.mulf %24, %25 : vector<4x256xf32>
    %c255_i32 = arith.constant 255 : i32
    %27 = tpu.dynamic_rotate %11 by %c255_i32 dim 1 : vector<4x256xf32>, i32 -> vector<4x256xf32>
    %28 = vector.broadcast %5 : vector<1x256xf32> to vector<4x256xf32>
    %29 = arith.mulf %27, %28 : vector<4x256xf32>
    %c241_i32 = arith.constant 241 : i32
    %30 = tpu.dynamic_rotate %11 by %c241_i32 dim 1 : vector<4x256xf32>, i32 -> vector<4x256xf32>
    %31 = vector.broadcast %6 : vector<1x256xf32> to vector<4x256xf32>
    %32 = arith.mulf %30, %31 : vector<4x256xf32>
    %c240_i32 = arith.constant 240 : i32
    %33 = tpu.dynamic_rotate %11 by %c240_i32 dim 1 : vector<4x256xf32>, i32 -> vector<4x256xf32>
    %34 = vector.broadcast %7 : vector<1x256xf32> to vector<4x256xf32>
    %35 = arith.mulf %33, %34 : vector<4x256xf32>
    %c239_i32 = arith.constant 239 : i32
    %36 = tpu.dynamic_rotate %11 by %c239_i32 dim 1 : vector<4x256xf32>, i32 -> vector<4x256xf32>
    %37 = vector.broadcast %8 : vector<1x256xf32> to vector<4x256xf32>
    %38 = arith.mulf %36, %37 : vector<4x256xf32>
    %39 = tpu.concatenate %17, %20, %23, %26, %11, %29, %32, %35, %38 in 0 : vector<4x256xf32>, vector<4x256xf32>, vector<4x256xf32>, vector<4x256xf32>, vector<4x256xf32>, vector<4x256xf32>, vector<4x256xf32>, vector<4x256xf32>, vector<4x256xf32> -> vector<36x256xf32>
    %cst = arith.constant dense<0.000000e+00> : vector<8x256xf32>
    %40 = tpu.matmul %14, %39, %cst {dimension_numbers = #tpu.dot_dimension_numbers<[1], [0], [0], [1], [0, 0, 1, 1], [], []>} : vector<8x36xf32>, vector<36x256xf32>, vector<8x256xf32> -> vector<8x256xf32>
    %c0_11 = arith.constant 0 : index
    %c0_12 = arith.constant 0 : index
    %41 = vector.load %arg5[%c0_11, %c0_12] : memref<8x1xf32, #tpu.memory_space<vmem>>, vector<8x1xf32>
    %42 = vector.broadcast %41 : vector<8x1xf32> to vector<8x256xf32>
    %43 = arith.addf %40, %42 : vector<8x256xf32>
    %44 = arith.mulf %43, %43 : vector<8x256xf32>
    %cst_13 = arith.constant dense<0.000000e+00> : vector<256xf32>
    %45 = vector.multi_reduction <add>, %44, %cst_13 [0] : vector<8x256xf32> to vector<256xf32>
    %46 = vector.shape_cast %45 : vector<256xf32> to vector<1x256xf32>
    %cst_14 = arith.constant 1.000000e-24 : f32
    %47 = vector.broadcast %cst_14 : f32 to vector<1x256xf32>
    %48 = arith.maximumf %46, %47 : vector<1x256xf32>
    %49 = math.rsqrt %48 : vector<1x256xf32>
    %50 = vector.broadcast %9 : vector<8x1xf32> to vector<8x256xf32>
    %51 = arith.mulf %43, %50 : vector<8x256xf32>
    %cst_15 = arith.constant dense<0.000000e+00> : vector<256xf32>
    %52 = vector.multi_reduction <add>, %51, %cst_15 [0] : vector<8x256xf32> to vector<256xf32>
    %53 = vector.shape_cast %52 : vector<256xf32> to vector<1x256xf32>
    %54 = arith.mulf %53, %49 : vector<1x256xf32>
    %cst_16 = arith.constant 1.000000e+00 : f32
    %55 = vector.broadcast %cst_16 : f32 to vector<1x256xf32>
    %56 = arith.addf %54, %55 : vector<1x256xf32>
    %57 = vector.broadcast %56 : vector<1x256xf32> to vector<8x256xf32>
    %58 = arith.mulf %43, %57 : vector<8x256xf32>
    %59 = arith.mulf %13, %13 : vector<8x256xf32>
    %cst_17 = arith.constant dense<0.000000e+00> : vector<256xf32>
    %60 = vector.multi_reduction <add>, %59, %cst_17 [0] : vector<8x256xf32> to vector<256xf32>
    %61 = vector.shape_cast %60 : vector<256xf32> to vector<1x256xf32>
    %cst_18 = arith.constant 1.000000e-24 : f32
    %62 = vector.broadcast %cst_18 : f32 to vector<1x256xf32>
    %63 = arith.maximumf %61, %62 : vector<1x256xf32>
    %64 = math.rsqrt %63 : vector<1x256xf32>
    %65 = vector.broadcast %9 : vector<8x1xf32> to vector<8x256xf32>
    %66 = arith.mulf %13, %65 : vector<8x256xf32>
    %cst_19 = arith.constant dense<0.000000e+00> : vector<256xf32>
    %67 = vector.multi_reduction <add>, %66, %cst_19 [0] : vector<8x256xf32> to vector<256xf32>
    %68 = vector.shape_cast %67 : vector<256xf32> to vector<1x256xf32>
    %69 = arith.mulf %68, %64 : vector<1x256xf32>
    %cst_20 = arith.constant 1.000000e+00 : f32
    %70 = vector.broadcast %cst_20 : f32 to vector<1x256xf32>
    %71 = arith.addf %69, %70 : vector<1x256xf32>
    %72 = vector.broadcast %71 : vector<1x256xf32> to vector<8x256xf32>
    %73 = arith.mulf %13, %72 : vector<8x256xf32>
    %74 = arith.addf %73, %58 : vector<8x256xf32>
    %c0_21 = arith.constant 0 : index
    %c0_22 = arith.constant 0 : index
    %75 = vector.load %arg7[%c0_21, %c0_22] : memref<8x72xf32, #tpu.memory_space<vmem>>, vector<8x72xf32>
    %c17_i32_23 = arith.constant 17 : i32
    %76 = tpu.dynamic_rotate %74 by %c17_i32_23 dim 1 : vector<8x256xf32>, i32 -> vector<8x256xf32>
    %77 = vector.broadcast %1 : vector<1x256xf32> to vector<8x256xf32>
    %78 = arith.mulf %76, %77 : vector<8x256xf32>
    %c16_i32_24 = arith.constant 16 : i32
    %79 = tpu.dynamic_rotate %74 by %c16_i32_24 dim 1 : vector<8x256xf32>, i32 -> vector<8x256xf32>
    %80 = vector.broadcast %2 : vector<1x256xf32> to vector<8x256xf32>
    %81 = arith.mulf %79, %80 : vector<8x256xf32>
    %c15_i32_25 = arith.constant 15 : i32
    %82 = tpu.dynamic_rotate %74 by %c15_i32_25 dim 1 : vector<8x256xf32>, i32 -> vector<8x256xf32>
    %83 = vector.broadcast %3 : vector<1x256xf32> to vector<8x256xf32>
    %84 = arith.mulf %82, %83 : vector<8x256xf32>
    %c1_i32_26 = arith.constant 1 : i32
    %85 = tpu.dynamic_rotate %74 by %c1_i32_26 dim 1 : vector<8x256xf32>, i32 -> vector<8x256xf32>
    %86 = vector.broadcast %4 : vector<1x256xf32> to vector<8x256xf32>
    %87 = arith.mulf %85, %86 : vector<8x256xf32>
    %c255_i32_27 = arith.constant 255 : i32
    %88 = tpu.dynamic_rotate %74 by %c255_i32_27 dim 1 : vector<8x256xf32>, i32 -> vector<8x256xf32>
    %89 = vector.broadcast %5 : vector<1x256xf32> to vector<8x256xf32>
    %90 = arith.mulf %88, %89 : vector<8x256xf32>
    %c241_i32_28 = arith.constant 241 : i32
    %91 = tpu.dynamic_rotate %74 by %c241_i32_28 dim 1 : vector<8x256xf32>, i32 -> vector<8x256xf32>
    %92 = vector.broadcast %6 : vector<1x256xf32> to vector<8x256xf32>
    %93 = arith.mulf %91, %92 : vector<8x256xf32>
    %c240_i32_29 = arith.constant 240 : i32
    %94 = tpu.dynamic_rotate %74 by %c240_i32_29 dim 1 : vector<8x256xf32>, i32 -> vector<8x256xf32>
    %95 = vector.broadcast %7 : vector<1x256xf32> to vector<8x256xf32>
    %96 = arith.mulf %94, %95 : vector<8x256xf32>
    %c239_i32_30 = arith.constant 239 : i32
    %97 = tpu.dynamic_rotate %74 by %c239_i32_30 dim 1 : vector<8x256xf32>, i32 -> vector<8x256xf32>
    %98 = vector.broadcast %8 : vector<1x256xf32> to vector<8x256xf32>
    %99 = arith.mulf %97, %98 : vector<8x256xf32>
    %100 = tpu.concatenate %78, %81, %84, %87, %74, %90, %93, %96, %99 in 0 : vector<8x256xf32>, vector<8x256xf32>, vector<8x256xf32>, vector<8x256xf32>, vector<8x256xf32>, vector<8x256xf32>, vector<8x256xf32>, vector<8x256xf32>, vector<8x256xf32> -> vector<72x256xf32>
    %cst_31 = arith.constant dense<0.000000e+00> : vector<8x256xf32>
    %101 = tpu.matmul %75, %100, %cst_31 {dimension_numbers = #tpu.dot_dimension_numbers<[1], [0], [0], [1], [0, 0, 1, 1], [], []>} : vector<8x72xf32>, vector<72x256xf32>, vector<8x256xf32> -> vector<8x256xf32>
    %c0_32 = arith.constant 0 : index
    %c0_33 = arith.constant 0 : index
    %102 = vector.load %arg8[%c0_32, %c0_33] : memref<8x1xf32, #tpu.memory_space<vmem>>, vector<8x1xf32>
    %103 = vector.broadcast %102 : vector<8x1xf32> to vector<8x256xf32>
    %104 = arith.addf %101, %103 : vector<8x256xf32>
    %cst_34 = arith.constant 0.000000e+00 : f32
    %105 = vector.broadcast %cst_34 : f32 to vector<8x256xf32>
    %106 = arith.maximumf %104, %105 : vector<8x256xf32>
    %107 = vector.shape_cast %106 : vector<8x256xf32> to vector<1x8x256xf32>
    %c0_35 = arith.constant 0 : index
    %c0_36 = arith.constant 0 : index
    %c0_37 = arith.constant 0 : index
    %108 = vector.load %arg9[%c0_35, %c0_36, %c0_37] : memref<1x8x256xf32, #tpu.memory_space<vmem>>, vector<1x8x256xf32>
    tpu.vector_store %arg9[%c0_35, %c0_36, %c0_37], %107 {strides = array<i32>} : memref<1x8x256xf32, #tpu.memory_space<vmem>>, vector<1x8x256xf32>,
    return
  }
  func.func @transform_0(%arg0: i32) -> (i32, i32, i32) {
    %c0_i32 = arith.constant 0 : i32
    %c0_i32_0 = arith.constant 0 : i32
    %c0_i32_1 = arith.constant 0 : i32
    return %arg0, %c0_i32, %c0_i32_0 : i32, i32, i32
  }
  func.func @transform_1(%arg0: i32) -> (i32, i32, i32) {
    %c0_i32 = arith.constant 0 : i32
    %c0_i32_0 = arith.constant 0 : i32
    %c0_i32_1 = arith.constant 0 : i32
    return %arg0, %c0_i32, %c0_i32_0 : i32, i32, i32
  }
  func.func @transform_2(%arg0: i32) -> (i32, i32) {
    %c0_i32 = arith.constant 0 : i32
    %c0_i32_0 = arith.constant 0 : i32
    %c0_i32_1 = arith.constant 0 : i32
    return %c0_i32, %c0_i32_0 : i32, i32
  }
  func.func @transform_3(%arg0: i32) -> (i32, i32) {
    %c0_i32 = arith.constant 0 : i32
    %c0_i32_0 = arith.constant 0 : i32
    %c0_i32_1 = arith.constant 0 : i32
    return %c0_i32, %c0_i32_0 : i32, i32
  }
  func.func @transform_4(%arg0: i32) -> (i32, i32) {
    %c0_i32 = arith.constant 0 : i32
    %c0_i32_0 = arith.constant 0 : i32
    %c0_i32_1 = arith.constant 0 : i32
    return %c0_i32, %c0_i32_0 : i32, i32
  }
  func.func @transform_5(%arg0: i32) -> (i32, i32) {
    %c0_i32 = arith.constant 0 : i32
    %c0_i32_0 = arith.constant 0 : i32
    %c0_i32_1 = arith.constant 0 : i32
    return %c0_i32, %c0_i32_0 : i32, i32
  }
  func.func @transform_6(%arg0: i32) -> (i32, i32) {
    %c0_i32 = arith.constant 0 : i32
    %c0_i32_0 = arith.constant 0 : i32
    %c0_i32_1 = arith.constant 0 : i32
    return %c0_i32, %c0_i32_0 : i32, i32
  }
  func.func @transform_7(%arg0: i32) -> (i32, i32) {
    %c0_i32 = arith.constant 0 : i32
    %c0_i32_0 = arith.constant 0 : i32
    %c0_i32_1 = arith.constant 0 : i32
    return %c0_i32, %c0_i32_0 : i32, i32
  }
  func.func @transform_8(%arg0: i32) -> (i32, i32, i32) {
    %c0_i32 = arith.constant 0 : i32
    %c0_i32_0 = arith.constant 0 : i32
    %c0_i32_1 = arith.constant 0 : i32
    return %arg0, %c0_i32, %c0_i32_0 : i32, i32, i32
  }
}

</mosaic_0001>

<bundles_post_ra>
// kernel: interaction_forward.1
= control target key start
LH: loop header
LB: loop body
LE: loop exit
PB: predicated region body
PF: predicated region fallthrough
CT: control target
= control target key end

     0   :  { %s1034_s27 = smov 0   ;;  %s1355_s0 = inlined_call_operand.vmem [shape: f32[2,4,256], index: 0, kind: input, shape index: {}]   ;;  %s1356_s1 = inlined_call_operand.vmem [shape: f32[2,8,256], index: 1, kind: input, shape index: {}]   ;;  %s1357_s2 = inlined_call_operand.vmem [shape: f32[9,256], index: 2, kind: input, shape index: {}]   ;;  %s1358_s3 = inlined_call_operand.vmem [shape: f32[8,36], index: 3, kind: input, shape index: {}]   ;;  %s1359_s4 = inlined_call_operand.vmem [shape: f32[8,1], index: 4, kind: input, shape index: {}]   ;;  %s1360_s5 = inlined_call_operand.vmem [shape: f32[8,1], index: 5, kind: input, shape index: {}]   ;;  %s1361_s6 = inlined_call_operand.vmem [shape: f32[8,72], index: 6, kind: input, shape index: {}]   ;;  %s1362_s7 = inlined_call_operand.vmem [shape: f32[8,1], index: 7, kind: input, shape index: {}]   ;;  %s1363_s8 = inlined_call_operand.vmem [shape: f32[2,8,256], index: 8, kind: output, shape index: {}]  }
   0x1 LB: > { %s896_s28 = sadd.s32 4294967295, %s977_s27   ;;  %p900_p0 = scmp.ge.s32.totalorder %s977_s27, 1  ;;  %s977_s27 = sphi %s1034_s27, %s18_s27  }
   0x2   : > { %p272_p1 = scmp.lt.s32.totalorder %s977_s27, 3 }
   0x4   : > { %p273_p2 = pnand %p900_p0, %p272_p1 }
   0x5   : > { %p311_p3 = scmp.lt.s32.totalorder (!%p273_p2), %s896_s28, 1  ;;  %s979_s11 = smov (!%p273_p2), 1   ;;  %v985_v2 = vmov (!%p273_p2), 0.0   ;;  %v987_v3 = vmov (!%p273_p2), 0   ;;  %v509_v4 = vld [vmem:[%s1359_s4] sm:$0xff] (!%p273_p2)  ;;  %v342_v6 = vlaneseq (!%p273_p2)  ;;  %v1105_v13 = vld [vmem:[%s1357_s2 + $0x8] sm:$0xff] (!%p273_p2) }
   0x6   : > { %276 = sbr.rel (%p273_p2) target bundleno = 786 (0x312), region = 52  ;;  %s980_s12 = smov (!%p273_p2), 16   ;;  %589 = vmatprep.mubr.f32.mxu0 (!%p273_p2), %v985_v2  ;;  %818 = vmatprep.mubr.f32.mxu1 (!%p273_p2), %v985_v2  ;;  %v330_v5 = vld [vmem:[%s1360_s5] sm:$0xff] (!%p273_p2)  ;;  %vm500_vm4 = vcmask (!%p273_p2), 1043456   ;;  %vm515_vm9 = vcmask (!%p273_p2), 293888   ;;  %vm750_vm10 = vcmask (!%p273_p2), 588800  }
   0x7   : > { %s981_s13 = smov (!%p273_p2), 17   ;;  %s982_s14 = smov (!%p273_p2), 15   ;;  %960 = vset.pattern.permute.xlu0 (!%p273_p2), %v987_v3  ;;  %961 = vset.pattern.permute.xlu1 (!%p273_p2), %v987_v3  ;;  %v1092_v7 = vshrl.u32 (!%p273_p2), %v342_v6, 7  ;;  %v1094_v8 = vand.u32 (!%p273_p2), 127, %v342_v6  ;;  %v1100_v12 = vld [vmem:[%s1357_s2] sm:$0xff] (!%p273_p2) }
   0x8   : > { %s983_s15 = smov (!%p273_p2), 127   ;;  %s984_s16 = smov (!%p273_p2), 112  }
   0x9   : > { %s986_s17 = smov (!%p273_p2), 113   ;;  %s988_s18 = smov (!%p273_p2), 111   ;;  %v400_v11 = vsub.s32 (!%p273_p2), 3, %v1092_v7  ;;  %v366_v14 = vsub.s32 (!%p273_p2), 1, %v1092_v7  ;;  %vm395_vm0 = vcmp.lt.s32.totalorder (!%p273_p2), %v1094_v8, 1  ;;  %v349_v17 = vsub.s32 (!%p273_p2), 0, %v1092_v7 }
   0xa   : > { %vm361_vm1 = vcmp.lt.s32.totalorder (!%p273_p2), %v1094_v8, 16  ;;  %v383_v20 = vsub.s32 (!%p273_p2), 2, %v1092_v7  ;;  %vm344_vm2 = vcmp.lt.s32.totalorder (!%p273_p2), %v1094_v8, 17  ;;  %vm378_vm3 = vcmp.lt.s32.totalorder (!%p273_p2), %v1094_v8, 15 }
   0xb   : > { %v1111_v18 = vrot.slane (!%p273_p2), %v1100_v12, %v400_v11  ;;  %v1114_v19 = vrot.slane (!%p273_p2), %v1105_v13, %v400_v11  ;;  %v1123_v23 = vrot.slane (!%p273_p2), %v1100_v12, %v366_v14  ;;  %v1126_v24 = vrot.slane (!%p273_p2), %v1105_v13, %v366_v14 }
   0xc   : > { %v1130_v25 = vrot.slane (!%p273_p2), %v1100_v12, %v349_v17  ;;  %v1133_v26 = vrot.slane (!%p273_p2), %v1105_v13, %v349_v17  ;;  %v1145_v35 = vrot.slane (!%p273_p2), %v1100_v12, %v383_v20  ;;  %v1148_v36 = vrot.slane (!%p273_p2), %v1105_v13, %v383_v20 }
   0xd   : > { %s1365_s28 = smov (!%p311_p3, %s896_s28), 1  ;;  %v417_v39 = vsub.s32 5, %v1092_v7  ;;  %vm412_vm5 = vcmp.lt.s32.totalorder %v1094_v8, 127  ;;  %v451_v44 = vsub.s32 7, %v1092_v7  ;;  %vm446_vm6 = vcmp.lt.s32.totalorder %v1094_v8, 112 }
   0xe   : > { %s915_s29 = sshll.u32 %s1365_s28, 3  ;;  %vm429_vm7 = vcmp.lt.s32.totalorder %v1094_v8, 113  ;;  %vm463_vm8 = vcmp.lt.s32.totalorder %v1094_v8, 111  ;;  %s916_s21 = sshll.u32 %s1365_s28, 4 }
   0xf   : > { %s315_s10 = scalar_lea.vmem %s1355_s0, %s915_s29  ;;  %v1166_v53 = vrot.slane %v1100_v12, %v417_v39  ;;  %v1169_v54 = vrot.slane %v1105_v13, %v417_v39  ;;  %v1181_v3 = vrot.slane %v1100_v12, %v451_v44  ;;  %s320_s24 = scalar_lea.vmem %s1356_s1, %s916_s21 }
  0x10   : > { %v1048_v0 = vld [vmem:[%s315_s10] sm:$0xff] }
  0x11   : > { %391 = vrot.lane.b32.xlu1 %v1048_v0, %s979_s11  ;;  %357 = vrot.lane.b32.xlu0 %v1048_v0, %s980_s12  ;;  %v1056_v1 = vcombine.high %v1048_v0, %v1048_v0 }
  0x15   : > { %338 = vrot.lane.b32.xlu0 %v1048_v0, %s981_s13  ;;  %393 = vrot.lane.b32.xlu1 %v1056_v1, %s979_s11 }
  0x19   : > { %340 = vrot.lane.b32.xlu1 %v1056_v1, %s981_s13  ;;  %359 = vrot.lane.b32.xlu0 %v1056_v1, %s980_s12 }
  0x1d   : > { %376 = vrot.lane.b32.xlu1 %v1056_v1, %s982_s14  ;;  %374 = vrot.lane.b32.xlu0 %v1048_v0, %s982_s14 }
  0x21   : > { %410 = vrot.lane.b32.xlu1 %v1056_v1, %s983_s15  ;;  %408 = vrot.lane.b32.xlu0 %v1048_v0, %s983_s15 }
  0x25   : > { %444 = vrot.lane.b32.xlu1 %v1056_v1, %s984_s16  ;;  %442 = vrot.lane.b32.xlu0 %v1048_v0, %s984_s16 }
  0x29   : > { %427 = vrot.lane.b32.xlu1 %v1056_v1, %s986_s17  ;;  %425 = vrot.lane.b32.xlu0 %v1048_v0, %s986_s17 }
  0x2d   : > { %461 = vrot.lane.b32.xlu1 %v1056_v1, %s988_s18  ;;  %459 = vrot.lane.b32.xlu0 %v1048_v0, %s988_s18 }
  0x31   : > { %512 = vperm.xlu0 %960, %v509_v4   ;;  %616 = vperm.xlu1 %961, %v330_v5   ;;  %v1184_v4 = vrot.slane %v1105_v13, %v451_v44  ;;  %v434_v5 = vsub.s32 6, %v1092_v7 }
  0x33   : > { %v1197_v17 = vrot.slane %v1100_v12, %v434_v5  ;;  %v1200_v20 = vrot.slane %v1105_v13, %v434_v5  ;;  %v1212_v13 = vld [vmem:[%s1357_s2 + $0x18] ss:$0 sm:$0xff] }
  0x83   : > { %v392_v9 = vpop.permute.xlu1 %391  ;;  %v358_v10 = vpop.permute.xlu0 %357 }
  0x87   : > { %v339_v15 = vpop.permute.xlu0 %338  ;;  %v394_v16 = vpop.permute.xlu1 %393 }
  0x88   : > { %v396_v21 = vsel %vm395_vm0, %v392_v9, %v394_v16  ;;  %v397_v22 = vsel %vm395_vm0, %v394_v16, %v392_v9 }
  0x89   : > { %v406_v29 = vmul.f32 %v1111_v18, %v397_v22  ;;  %v407_v30 = vmul.f32 %v1114_v19, %v396_v21 }
  0x8b   : > { %v341_v27 = vpop.permute.xlu1 %340  ;;  %v360_v28 = vpop.permute.xlu0 %359  ;;  %v484_v45 = vrot.slane %v406_v29, 4  ;;  %v485_v46 = vrot.slane %v407_v30, 4 }
  0x8c   : > { %v362_v31 = vsel %vm361_vm1, %v358_v10, %v360_v28  ;;  %v363_v32 = vsel %vm361_vm1, %v360_v28, %v358_v10  ;;  %v345_v37 = vsel %vm344_vm2, %v339_v15, %v341_v27  ;;  %v346_v38 = vsel %vm344_vm2, %v341_v27, %v339_v15 }
  0x8d   : > { %v372_v33 = vmul.f32 %v1123_v23, %v363_v32  ;;  %v373_v34 = vmul.f32 %v1126_v24, %v362_v31  ;;  %v355_v49 = vmul.f32 %v1130_v25, %v346_v38  ;;  %v356_v50 = vmul.f32 %v1133_v26, %v345_v37 }
  0x8f   : > { %v478_v40 = vrot.slane %v372_v33, 4  ;;  %v479_v41 = vrot.slane %v373_v34, 4  ;;  %v377_v42 = vpop.permute.xlu1 %376  ;;  %v375_v43 = vpop.permute.xlu0 %374 }
  0x90   : > { %v379_v47 = vsel %vm378_vm3, %v375_v43, %v377_v42  ;;  %v380_v48 = vsel %vm378_vm3, %v377_v42, %v375_v43  ;;  %v1223_v43 = vld [vmem:[%s1357_s2 + $0x10] ss:$0 sm:$0xff] }
  0x91   : > { %v389_v51 = vmul.f32 %v1145_v35, %v380_v48  ;;  %v390_v52 = vmul.f32 %v1148_v36, %v379_v47  ;;  %v502_v57 = vsel %vm500_vm4, %v356_v50, %v479_v41  ;;  %v501_v59 = vsel %vm500_vm4, %v355_v49, %v478_v40  ;;  %v334_v47 = vld [vmem:[%s1358_s3] sm:$0xff]  ;;  %v1244_v49 = vld [vmem:[%s320_s24 + $0x8] sm:$0xff] }
  0x92   : > { %v1242_v48 = vld [vmem:[%s320_s24] sm:$0xff] }
  0x93   : > { %v411_v55 = vpop.permute.xlu1 %410  ;;  %v409_v56 = vpop.permute.xlu0 %408  ;;  %v504_v58 = vsel %vm500_vm4, %v390_v52, %v485_v46  ;;  %v503_v60 = vsel %vm500_vm4, %v389_v51, %v484_v45  ;;  %v639_v50 = vmul.f32 %v1242_v48, %v1242_v48  ;;  %v640_v51 = vmul.f32 %v1244_v49, %v1244_v49 }
  0x94   : > { %v413_v61 = vsel %vm412_vm5, %v409_v56, %v411_v55  ;;  %v414_v62 = vsel %vm412_vm5, %v411_v55, %v409_v56  ;;  %v918_v63 = vpack.c.bf16 %v504_v58, %v502_v57  ;;  %v920_v2 = vpack.c.bf16 %v503_v60, %v501_v59 }
  0x95   : > { %v423_v6 = vmul.f32 %v1166_v53, %v413_v61  ;;  %v424_v9 = vmul.f32 %v1169_v54, %v414_v62  ;;  %v641_v52 = vrot.slane %v639_v50, 4  ;;  %v647_v55 = vrot.slane %v640_v51, 4 }
  0x96   : > { %919 = vmatprep.subr.bf16.mxu0 %v918_v63 }
  0x97   : > { %v445_v10 = vpop.permute.xlu1 %444  ;;  %921 = vmatpush1.bf16.msra.mxu0 %v920_v2  ;;  %v443_v11 = vpop.permute.xlu0 %442  ;;  %v490_v21 = vrot.slane %v423_v6, 4  ;;  %v491_v22 = vrot.slane %v424_v9, 4  ;;  %v642_v56 = vadd.f32 %v641_v52, %v639_v50  ;;  %v648_v57 = vadd.f32 %v647_v55, %v640_v51 }
  0x98   : > { %v447_v14 = vsel %vm446_vm6, %v443_v11, %v445_v10  ;;  %v448_v15 = vsel %vm446_vm6, %v445_v10, %v443_v11 }
  0x99   : > { %v457_v16 = vmul.f32 %v1181_v3, %v447_v14  ;;  %v458_v7 = vmul.f32 %v1184_v4, %v448_v15  ;;  %v506_v37 = vsel %vm500_vm4, %v1056_v1, %v491_v22  ;;  %v505_v40 = vsel %vm500_vm4, %v1048_v0, %v490_v21 }
  0x9a   : > { %v643_v58 = vrot.slane %v642_v56, 2  ;;  %v649_v59 = vrot.slane %v648_v57, 2 }
  0x9b   : > { %v428_v27 = vpop.permute.xlu1 %427  ;;  %v426_v28 = vpop.permute.xlu0 %425  ;;  %v496_v31 = vrot.slane %v457_v16, 4  ;;  %v497_v32 = vrot.slane %v458_v7, 4 }
  0x9c   : > { %v430_v29 = vsel %vm429_vm7, %v426_v28, %v428_v27  ;;  %v431_v30 = vsel %vm429_vm7, %v428_v27, %v426_v28  ;;  %v644_v60 = vadd.f32 %v643_v58, %v642_v56  ;;  %v650_v63 = vadd.f32 %v649_v59, %v648_v57 }
  0x9d   : > { %v440_v12 = vmul.f32 %v1197_v17, %v430_v29  ;;  %v441_v33 = vmul.f32 %v1200_v20, %v431_v30 }
  0x9e   : > { %v645_v11 = vrot.slane %v644_v60, 1  ;;  %v651_v15 = vrot.slane %v650_v63, 1 }
  0x9f   : > { %v462_v34 = vpop.permute.xlu1 %461  ;;  %v508_v38 = vsel %vm500_vm4, %v441_v33, %v497_v32  ;;  %v460_v39 = vpop.permute.xlu0 %459  ;;  %v507_v41 = vsel %vm500_vm4, %v440_v12, %v496_v31 }
  0xa0   : > { %v922_v42 = vpack.c.bf16 %v508_v38, %v506_v37  ;;  %v464_v44 = vsel %vm463_vm8, %v460_v39, %v462_v34  ;;  %v465_v1 = vsel %vm463_vm8, %v462_v34, %v460_v39  ;;  %v924_v45 = vpack.c.bf16 %v507_v41, %v505_v40 }
  0xa1   : > { %v475_v46 = vmul.f32 %v1212_v13, %v465_v1  ;;  %v474_v0 = vmul.f32 %v1223_v43, %v464_v44  ;;  %v646_v29 = vadd.f32 %v645_v11, %v644_v60  ;;  %v652_v32 = vadd.f32 %v651_v15, %v650_v63 }
  0xa2   : > { %923 = vmatprep.subr.bf16.mxu0 %v922_v42 }
  0xa3   : > { %925 = vmatpush1.bf16.msra.mxu0 %v924_v45  ;;  %v653_v40 = vmax.f32 %v646_v29, 1e-24  ;;  %v654_v44 = vmax.f32 %v652_v32, 1e-24 }
  0xa4   : > { %909 = vmatprep.subr.msk.mxu0 %vm500_vm4, %v475_v46 }
  0xa5   : > { %963 = vrsqrt.f32 %v653_v40 }
  0xa6   : > { %965 = vrsqrt.f32 %v654_v44 }
  0xa7   : > { %910 = vmatpush1.msk.msra.mxu0 %vm500_vm4, %v474_v0 }
  0xa8   : > { %911 = vmatmul.mubr.msk.f32.vlgmr.msra.gmra.mrb[0].mxu0 %vm515_vm9, %v334_v47 }
  0xaf   : > { %v964_v11 = vpop.eup %963 }
  0xb0   : > { %v617_v61 = vpop.permute.xlu1 %616  ;;  %v513_v62 = vpop.permute.xlu0 %512 }
  0xb1   : > { %v657_v2 = vmul.f32 %v617_v61, %v1242_v48  ;;  %v658_v5 = vmul.f32 %v617_v61, %v1244_v49 }
  0xb3   : > { %v659_v16 = vrot.slane %v657_v2, 4  ;;  %v665_v21 = vrot.slane %v658_v5, 4 }
  0xb5   : > { %v660_v12 = vadd.f32 %v659_v16, %v657_v2  ;;  %v666_v34 = vadd.f32 %v665_v21, %v658_v5  ;;  %v966_v16 = vpop.eup %965 }
  0xb7   : > { %v661_v1 = vrot.slane %v660_v12, 2  ;;  %v667_v46 = vrot.slane %v666_v34, 2 }
  0xb9   : > { %v662_v55 = vadd.f32 %v661_v1, %v660_v12  ;;  %v668_v57 = vadd.f32 %v667_v46, %v666_v34 }
  0xbb   : > { %v663_v63 = vrot.slane %v662_v55, 1  ;;  %v669_v2 = vrot.slane %v668_v57, 1 }
  0xbd   : > { %v670_v15 = vadd.f32 %v669_v2, %v668_v57 }
 0x17b   : > { %v591_v6 = vpop.f32.mrb[0].mxu0 }
 0x17c   : > { %v1252_v9 = vadd.f32 %v591_v6, %v513_v62  ;;  %v593_v10 = vpop.f32.mrb[1].mxu0 }
 0x17d   : > { %v1254_v14 = vadd.f32 %v593_v10, %v513_v62  ;;  %v664_v10 = vadd.f32 %v663_v63, %v662_v55 }
 0x17e   : > { %v596_v7 = vmul.f32 %v1252_v9, %v1252_v9  ;;  %v619_v27 = vmul.f32 %v617_v61, %v1252_v9 }
 0x17f   : > { %v597_v22 = vmul.f32 %v1254_v14, %v1254_v14  ;;  %v620_v30 = vmul.f32 %v617_v61, %v1254_v14 }
 0x180   : > { %v598_v28 = vrot.slane %v596_v7, 4  ;;  %v621_v38 = vrot.slane %v619_v27, 4 }
 0x181   : > { %v604_v31 = vrot.slane %v597_v22, 4  ;;  %v627_v41 = vrot.slane %v620_v30, 4 }
 0x182   : > { %v599_v33 = vadd.f32 %v598_v28, %v596_v7  ;;  %v622_v47 = vadd.f32 %v621_v38, %v619_v27  ;;  %v672_v27 = vmul.f32 %v966_v16, %v670_v15 }
 0x183   : > { %v605_v37 = vadd.f32 %v604_v31, %v597_v22  ;;  %v628_v51 = vadd.f32 %v627_v41, %v620_v30  ;;  %v671_v22 = vmul.f32 %v964_v11, %v664_v10 }
 0x184   : > { %v600_v39 = vrot.slane %v599_v33, 2  ;;  %v623_v59 = vrot.slane %v622_v47, 2  ;;  %v674_v34 = vadd.f32 1.0, %v672_v27 }
 0x185   : > { %v606_v42 = vrot.slane %v605_v37, 2  ;;  %v629_v61 = vrot.slane %v628_v51, 2  ;;  %v673_v12 = vadd.f32 1.0, %v671_v22 }
 0x186   : > { %v601_v45 = vadd.f32 %v600_v39, %v599_v33  ;;  %v624_v5 = vadd.f32 %v623_v59, %v622_v47 }
 0x187   : > { %v607_v0 = vadd.f32 %v606_v42, %v605_v37  ;;  %v630_v6 = vadd.f32 %v629_v61, %v628_v51  ;;  %v675_v40 = vmul.f32 %v673_v12, %v1242_v48  ;;  %v676_v42 = vmul.f32 %v674_v34, %v1244_v49  ;;  %v744_v48 = vld [vmem:[%s1362_s7] sm:$0xff] }
 0x188   : > { %v602_v50 = vrot.slane %v601_v45, 1  ;;  %v625_v7 = vrot.slane %v624_v5, 1 }
 0x189   : > { %v608_v52 = vrot.slane %v607_v0, 1  ;;  %v631_v21 = vrot.slane %v630_v6, 1 }
 0x18a   : > { %v603_v56 = vadd.f32 %v602_v50, %v601_v45  ;;  %v626_v28 = vadd.f32 %v625_v7, %v624_v5 }
 0x18b   : > { %v609_v58 = vadd.f32 %v608_v52, %v607_v0  ;;  %v632_v30 = vadd.f32 %v631_v21, %v630_v6 }
 0x18c   : > { %v610_v60 = vmax.f32 %v603_v56, 1e-24 }
 0x18d   : > { %v611_v62 = vmax.f32 %v609_v58, 1e-24 }
 0x18e   : > { %967 = vrsqrt.f32 %v610_v60 }
 0x18f   : > { %969 = vrsqrt.f32 %v611_v62 }
 0x198   : > { %v968_v29 = vpop.eup %967 }
 0x199   : > { %v970_v31 = vpop.eup %969  ;;  %v633_v32 = vmul.f32 %v968_v29, %v626_v28 }
 0x19a   : > { %v634_v33 = vmul.f32 %v970_v31, %v632_v30 }
 0x19b   : > { %v635_v37 = vadd.f32 1.0, %v633_v32 }
 0x19c   : > { %v636_v38 = vadd.f32 1.0, %v634_v33 }
 0x19d   : > { %v637_v39 = vmul.f32 %v635_v37, %v1252_v9 }
 0x19e   : > { %v638_v41 = vmul.f32 %v636_v38, %v1254_v14 }
 0x19f   : > { %v1266_v44 = vadd.f32 %v675_v40, %v637_v39 }
 0x1a0   : > { %v678_v1 = vadd.f32 %v676_v42, %v638_v41 }
 0x1a1   : > { %680 = vrot.lane.b32.xlu1 %v1266_v44, %s981_s13 }
 0x1a2   : > { %682 = vrot.lane.b32.xlu0 %v678_v1, %s981_s13 }
 0x1a5   : > { %688 = vrot.lane.b32.xlu1 %v1266_v44, %s980_s12 }
 0x1a6   : > { %690 = vrot.lane.b32.xlu0 %v678_v1, %s980_s12 }
 0x1a9   : > { %696 = vrot.lane.b32.xlu1 %v1266_v44, %s982_s14 }
 0x1aa   : > { %698 = vrot.lane.b32.xlu0 %v678_v1, %s982_s14 }
 0x1ad   : > { %704 = vrot.lane.b32.xlu1 %v1266_v44, %s979_s11 }
 0x1ae   : > { %706 = vrot.lane.b32.xlu0 %v678_v1, %s979_s11 }
 0x1b1   : > { %712 = vrot.lane.b32.xlu1 %v1266_v44, %s983_s15 }
 0x1b2   : > { %714 = vrot.lane.b32.xlu0 %v678_v1, %s983_s15 }
 0x1b5   : > { %720 = vrot.lane.b32.xlu1 %v1266_v44, %s986_s17 }
 0x1b6   : > { %722 = vrot.lane.b32.xlu0 %v678_v1, %s986_s17  ;;  %s325_s17 = scalar_lea.vmem %s1363_s8, %s916_s21 }
 0x1b9   : > { %728 = vrot.lane.b32.xlu1 %v1266_v44, %s984_s16 }
 0x1ba   : > { %730 = vrot.lane.b32.xlu0 %v678_v1, %s984_s16 }
 0x1bd   : > { %736 = vrot.lane.b32.xlu1 %v1266_v44, %s988_s18 }
 0x1be   : > { %738 = vrot.lane.b32.xlu0 %v678_v1, %s988_s18 }
 0x1c1   : > { %747 = vperm.xlu1 %961, %v744_v48  }
 0x213   : > { %v681_v49 = vpop.permute.xlu1 %680 }
 0x214   : > { %v683_v9 = vpop.permute.xlu0 %682 }
 0x215   : > { %v684_v14 = vsel %vm344_vm2, %v681_v49, %v683_v9  ;;  %v685_v45 = vsel %vm344_vm2, %v683_v9, %v681_v49 }
 0x216   : > { %v686_v51 = vmul.f32 %v685_v45, %v1130_v25  ;;  %v687_v55 = vmul.f32 %v684_v14, %v1133_v26 }
 0x217   : > { %v689_v46 = vpop.permute.xlu1 %688 }
 0x218   : > { %v691_v0 = vpop.permute.xlu0 %690 }
 0x219   : > { %v692_v47 = vsel %vm361_vm1, %v689_v46, %v691_v0  ;;  %v693_v50 = vsel %vm361_vm1, %v691_v0, %v689_v46 }
 0x21a   : > { %v694_v52 = vmul.f32 %v693_v50, %v1123_v23  ;;  %v695_v56 = vmul.f32 %v692_v47, %v1126_v24 }
 0x21b   : > { %v697_v57 = vpop.permute.xlu1 %696 }
 0x21c   : > { %v699_v58 = vpop.permute.xlu0 %698  ;;  %v926_v59 = vpack.c.bf16 %v695_v56, %v687_v55  ;;  %v928_v60 = vpack.c.bf16 %v694_v52, %v686_v51 }
 0x21d   : > { %v700_v61 = vsel %vm378_vm3, %v697_v57, %v699_v58  ;;  %v701_v62 = vsel %vm378_vm3, %v699_v58, %v697_v57 }
 0x21e   : > { %927 = vmatprep.subr.bf16.mxu1 %v926_v59  ;;  %v702_v26 = vmul.f32 %v701_v62, %v1145_v35  ;;  %v703_v2 = vmul.f32 %v700_v61, %v1148_v36 }
 0x21f   : > { %929 = vmatpush1.bf16.msra.mxu1 %v928_v60  ;;  %v705_v63 = vpop.permute.xlu1 %704 }
 0x220   : > { %v707_v25 = vpop.permute.xlu0 %706 }
 0x221   : > { %v708_v23 = vsel %vm395_vm0, %v705_v63, %v707_v25  ;;  %v709_v24 = vsel %vm395_vm0, %v707_v25, %v705_v63 }
 0x222   : > { %v710_v5 = vmul.f32 %v709_v24, %v1111_v18  ;;  %v711_v6 = vmul.f32 %v708_v23, %v1114_v19 }
 0x223   : > { %v713_v10 = vpop.permute.xlu1 %712 }
 0x224   : > { %v715_v11 = vpop.permute.xlu0 %714  ;;  %v930_v15 = vpack.c.bf16 %v711_v6, %v703_v2  ;;  %v932_v16 = vpack.c.bf16 %v710_v5, %v702_v26 }
 0x225   : > { %v716_v7 = vsel %vm412_vm5, %v713_v10, %v715_v11  ;;  %v717_v21 = vsel %vm412_vm5, %v715_v11, %v713_v10 }
 0x226   : > { %v718_v22 = vmul.f32 %v716_v7, %v1166_v53  ;;  %v719_v35 = vmul.f32 %v717_v21, %v1169_v54  ;;  %931 = vmatprep.subr.bf16.mxu1 %v930_v15 }
 0x227   : > { %933 = vmatpush1.bf16.msra.mxu1 %v932_v16  ;;  %v721_v36 = vpop.permute.xlu1 %720 }
 0x228   : > { %v723_v18 = vpop.permute.xlu0 %722  ;;  %v934_v27 = vpack.c.bf16 %v719_v35, %v678_v1  ;;  %v936_v19 = vpack.c.bf16 %v718_v22, %v1266_v44 }
 0x229   : > { %v724_v28 = vsel %vm429_vm7, %v721_v36, %v723_v18  ;;  %v725_v29 = vsel %vm429_vm7, %v723_v18, %v721_v36 }
 0x22a   : > { %935 = vmatprep.subr.bf16.mxu1 %v934_v27  ;;  %v726_v32 = vmul.f32 %v724_v28, %v1197_v17  ;;  %v727_v12 = vmul.f32 %v725_v29, %v1200_v20 }
 0x22b   : > { %937 = vmatpush1.bf16.msra.mxu1 %v936_v19  ;;  %v729_v30 = vpop.permute.xlu1 %728 }
 0x22c   : > { %v731_v31 = vpop.permute.xlu0 %730 }
 0x22d   : > { %v732_v53 = vsel %vm446_vm6, %v729_v30, %v731_v31  ;;  %v733_v54 = vsel %vm446_vm6, %v731_v31, %v729_v30 }
 0x22e   : > { %v734_v33 = vmul.f32 %v732_v53, %v1181_v3  ;;  %v735_v34 = vmul.f32 %v733_v54, %v1184_v4  ;;  %v679_v4 = vld [vmem:[%s1361_s6] sm:$0xff] }
 0x22f   : > { %v737_v37 = vpop.permute.xlu1 %736 }
 0x230   : > { %v739_v38 = vpop.permute.xlu0 %738  ;;  %v938_v39 = vpack.c.bf16 %v735_v34, %v727_v12  ;;  %v940_v40 = vpack.c.bf16 %v734_v33, %v726_v32 }
 0x231   : > { %v741_v41 = vsel %vm463_vm8, %v739_v38, %v737_v37  ;;  %v740_v42 = vsel %vm463_vm8, %v737_v37, %v739_v38 }
 0x232   : > { %v743_v44 = vmul.f32 %v1212_v13, %v741_v41  ;;  %939 = vmatprep.subr.bf16.mxu1 %v938_v39  ;;  %v742_v3 = vmul.f32 %v1223_v43, %v740_v42 }
 0x233   : > { %941 = vmatpush1.bf16.msra.mxu1 %v940_v40 }
 0x234   : > { %770 = vmatprep.subr.mxu1 %v743_v44 }
 0x237   : > { %771 = vmatpush1.msra.mxu1 %v742_v3 }
 0x238   : > { %912 = vmatmul.mubr.msk.f32.vlgmr.msra.gmra.mrb[0].mxu1 %vm750_vm10, %v679_v4 }
 0x240   : > { %v748_v17 = vpop.permute.xlu1 %747 }
 0x30b   : > { %v820_v20 = vpop.f32.mrb[0].mxu1 }
 0x30c   : > { %v821_v1 = vadd.f32 %v820_v20, %v748_v17  ;;  %v822_v48 = vpop.f32.mrb[1].mxu1 }
 0x30d   : > { %v823_v8 = vadd.f32 %v822_v48, %v748_v17 }
 0x30e   : > { %v825_v13 = vmax.f32 %v821_v1, 0.0 }
 0x30f   : > { %v826_v49 = vmax.f32 %v823_v8, 0.0 }
 0x310   : > { %827 = vst [vmem:[%s325_s17] sm:$0xff] %v825_v13 }
 0x311   : > { %828 = vst [vmem:[%s325_s17 + $0x8] sm:$0xff] %v826_v49 }
 0x312 PF: > { %s18_s27 = sadd.s32 1, %s977_s27  }
 0x313   : > { %p15_p4 = scmp.ge.s32.totalorder %s18_s27, 4  }
 0x315   :  { %17 = sbr.rel (!%p15_p4) target bundleno = 1 (0x1), region = 85 }

</bundles_post_ra>
